<compile_context>
chip_gen: v5e
topology: v5e:2x2
jax: 0.10.0
libtpu: 0.0.40
codegen_flags: <defaults>
</compile_context>

<pallas_src>
import functools

import jax
import jax.numpy as jnp
from jax.experimental import pallas as pl
from jax.experimental.pallas import tpu as pltpu


# ---------------------------------------------------------------------------
# Kernels
# ---------------------------------------------------------------------------
def _broadcast_kernel(p_ref, o_ref):
    """Pure broadcast: copy the (H, P, d_head) prefix tile to one (layer2, b) slot."""
    o_ref[...] = p_ref[...]


def _dropout_broadcast_kernel(p_ref, m_ref, o_ref, *, scale: float):
    """Broadcast + inverted dropout using a precomputed uint8 keep mask."""
    x = p_ref[...].astype(jnp.float32)
    keep = m_ref[...] != 0
    y = jnp.where(keep, x * jnp.float32(scale), jnp.float32(0.0))
    o_ref[...] = y.astype(o_ref.dtype)


# ---------------------------------------------------------------------------
# Helpers
# ---------------------------------------------------------------------------
def _dropout_keep_mask(rng, shape, dropout_p):
    """uint8 keep-mask (1 = keep) matching nn.Dropout(p) semantics."""
    return jax.random.bernoulli(rng, 1.0 - dropout_p, shape).astype(jnp.uint8)


# ---------------------------------------------------------------------------
# Forward
# ---------------------------------------------------------------------------
def flat_prefix_tuning_forward(
    control_trans: jax.Array,
    batch_size: int,
    *,
    prefix_length: int,
    n_layers: int,
    n_heads: int,
    input_size: int,
    dropout_p: float = 0.0,
    dropout_rng=None,
    eval_fast_path: bool = True,
):
    """Returns a tuple of n_layers arrays, each (2, B, n_heads, prefix_len, d_head)."""
    assert input_size % n_heads == 0
    d_head = input_size // n_heads
    l2 = n_layers * 2
    assert control_trans.shape == (prefix_length * l2 * input_size,)
    dtype = control_trans.dtype

    # Tiny, parameter-sized re-layout (B-independent):
    #   flat -> (P, 2L, H, d) -> (2L, H, P, d)
    params = control_trans.reshape(prefix_length, l2, n_heads, d_head)
    params = jnp.transpose(params, (1, 2, 0, 3))  # (2L, H, P, d)

    out5_shape = (l2, batch_size, n_heads, prefix_length, d_head)

    if dropout_p == 0.0 and eval_fast_path:
        # Eval fast path: no kernel, no materialized B copies here; under jit
        # the broadcast fuses into the consumer.
        kv = jnp.broadcast_to(params[:, None], out5_shape)
    else:
        in_specs = [
            # Shared prefix tile: index constant in the (inner) batch axis, so
            # Pallas fetches it once per layer-slot.
            pl.BlockSpec(
                (None, n_heads, prefix_length, d_head),
                lambda j, b: (j, 0, 0, 0),
            ),
        ]
        inputs = [params]

        if dropout_p > 0.0:
            if dropout_rng is None:
                dropout_rng = jax.random.PRNGKey(0)
            keep = _dropout_keep_mask(dropout_rng, out5_shape, dropout_p)
            in_specs.append(
                pl.BlockSpec(
                    (None, None, n_heads, prefix_length, d_head),
                    lambda j, b: (j, b, 0, 0, 0),
                )
            )
            inputs.append(keep)
            kernel = functools.partial(
                _dropout_broadcast_kernel, scale=1.0 / (1.0 - dropout_p)
            )
        else:
            kernel = _broadcast_kernel

        kv = pl.pallas_call(
            kernel,
            out_shape=jax.ShapeDtypeStruct(out5_shape, dtype),
            grid=(l2, batch_size),  # batch innermost -> input re-DMA skipped
            in_specs=in_specs,
            out_specs=pl.BlockSpec(
                (None, None, n_heads, prefix_length, d_head),
                lambda j, b: (j, b, 0, 0, 0),
            ),
            compiler_params=pltpu.CompilerParams(
                dimension_semantics=("parallel", "parallel"),
            ),
        )(*inputs)

    # .split(2) equivalent: per-layer views of the leading axis.
    kv = kv.reshape(n_layers, 2, batch_size, n_heads, prefix_length, d_head)
    return tuple(kv[i] for i in range(n_layers))


# ---------------------------------------------------------------------------
# Self-test
# ---------------------------------------------------------------------------
if __name__ == "__main__":
    n_layers = 2
    n_heads = 4
    input_size = 32  # hidden size
    prefix_length = 8
    batch_size = 2
    d_head = input_size // n_heads
    l2 = n_layers * 2

    key = jax.random.PRNGKey(0)
    k_param, k_drop = jax.random.split(key)
    # nn.Parameter(torch.randn(prefix_length * n_layers * 2 * input_size))
    control_trans = jax.random.normal(
        k_param, (prefix_length * l2 * input_size,), dtype=jnp.float32
    )

    # Pure-JAX reference of the PyTorch forward (no dropout).
    ref = jnp.broadcast_to(control_trans[None, :], (batch_size, control_trans.shape[0]))
    ref = ref.reshape(batch_size, prefix_length, l2, n_heads, d_head)
    ref = jnp.transpose(ref, (2, 0, 3, 1, 4))  # (2L, B, H, P, d)
    ref_split = tuple(ref[2 * i : 2 * (i + 1)] for i in range(n_layers))

    common = dict(
        prefix_length=prefix_length,
        n_layers=n_layers,
        n_heads=n_heads,
        input_size=input_size,
    )

    # 1) eval mode through the Pallas kernel (force kernel path).
    kvs = flat_prefix_tuning_forward(
        control_trans, batch_size, dropout_p=0.0, eval_fast_path=False, **common
    )
    kvs = jax.block_until_ready(kvs)
    assert len(kvs) == n_layers
    for got, want in zip(kvs, ref_split):
        assert got.shape == (2, batch_size, n_heads, prefix_length, d_head), got.shape
        assert got.dtype == control_trans.dtype
        assert jnp.array_equal(got, want), "kernel eval path mismatch vs reference"

    # 2) eval fast path (no kernel): must match as well.
    kvs_fast = flat_prefix_tuning_forward(
        control_trans, batch_size, dropout_p=0.0, eval_fast_path=True, **common
    )
    kvs_fast = jax.block_until_ready(kvs_fast)
    for got, want in zip(kvs_fast, ref_split):
        assert jnp.array_equal(got, want), "eval fast path mismatch vs reference"

    # 3) training mode: in-kernel dropout against an exact reference built from
    #    the same keep mask.
    p = 0.1
    kvs_drop = flat_prefix_tuning_forward(
        control_trans, batch_size, dropout_p=p, dropout_rng=k_drop, **common
    )
    kvs_drop = jax.block_until_ready(kvs_drop)

    keep = _dropout_keep_mask(
        k_drop, (l2, batch_size, n_heads, prefix_length, d_head), p
    )
    ref_drop = jnp.where(
        keep != 0, ref * jnp.float32(1.0 / (1.0 - p)), jnp.float32(0.0)
    ).astype(control_trans.dtype)
    ref_drop_split = tuple(ref_drop[2 * i : 2 * (i + 1)] for i in range(n_layers))
    for got, want in zip(kvs_drop, ref_drop_split):
        assert got.shape == (2, batch_size, n_heads, prefix_length, d_head)
        assert jnp.allclose(got, want, rtol=1e-6, atol=1e-6), "dropout path mismatch"

    print("KERNEL_OK")
</pallas_src>

<mosaic_0001>
module attributes {stable_mosaic.version = 11 : i64} {
  func.func @_broadcast_kernel(%arg0: i32, %arg1: i32, %arg2: memref<1x4x8x8xf32, #tpu.memory_space<vmem>>, %arg3: memref<1x1x4x8x8xf32, #tpu.memory_space<vmem>>) attributes {dimension_semantics = [#tpu.dimension_semantics<parallel>, #tpu.dimension_semantics<parallel>], iteration_bounds = array<i64: 4, 2>, scalar_prefetch = 0 : i64, scratch_operands = 0 : i64, tpu.core_type = #tpu.core_type<tc>, window_params = [{transform_indices = @transform_0, window_bounds = array<i64: 1, 4, 8, 8>}, {transform_indices = @transform_1, window_bounds = array<i64: 1, 1, 4, 8, 8>}]} {
    %c0 = arith.constant 0 : index
    %c0_0 = arith.constant 0 : index
    %c0_1 = arith.constant 0 : index
    %c0_2 = arith.constant 0 : index
    %0 = vector.load %arg2[%c0, %c0_0, %c0_1, %c0_2] : memref<1x4x8x8xf32, #tpu.memory_space<vmem>>, vector<1x4x8x8xf32>
    %1 = vector.shape_cast %0 : vector<1x4x8x8xf32> to vector<4x8x8xf32>
    %c0_3 = arith.constant 0 : index
    %c0_4 = arith.constant 0 : index
    %c0_5 = arith.constant 0 : index
    %c0_6 = arith.constant 0 : index
    %c0_7 = arith.constant 0 : index
    %2 = vector.load %arg3[%c0_3, %c0_4, %c0_5, %c0_6, %c0_7] : memref<1x1x4x8x8xf32, #tpu.memory_space<vmem>>, vector<1x1x4x8x8xf32>
    %3 = vector.shape_cast %2 : vector<1x1x4x8x8xf32> to vector<4x8x8xf32>
    %4 = vector.shape_cast %1 : vector<4x8x8xf32> to vector<1x1x4x8x8xf32>
    tpu.vector_store %arg3[%c0_3, %c0_4, %c0_5, %c0_6, %c0_7], %4 {strides = array<i32>} : memref<1x1x4x8x8xf32, #tpu.memory_space<vmem>>, vector<1x1x4x8x8xf32>,
    return
  }
  func.func @transform_0(%arg0: i32, %arg1: i32) -> (i32, i32, i32, i32) {
    %c0_i32 = arith.constant 0 : i32
    %c0_i32_0 = arith.constant 0 : i32
    %c0_i32_1 = arith.constant 0 : i32
    %c0_i32_2 = arith.constant 0 : i32
    return %arg0, %c0_i32, %c0_i32_0, %c0_i32_1 : i32, i32, i32, i32
  }
  func.func @transform_1(%arg0: i32, %arg1: i32) -> (i32, i32, i32, i32, i32) {
    %c0_i32 = arith.constant 0 : i32
    %c0_i32_0 = arith.constant 0 : i32
    %c0_i32_1 = arith.constant 0 : i32
    %c0_i32_2 = arith.constant 0 : i32
    return %arg0, %arg1, %c0_i32, %c0_i32_0, %c0_i32_1 : i32, i32, i32, i32, i32
  }
}

</mosaic_0001>

<bundles_post_ra>
// kernel: tpu_custom_call.1
= control target key start
LH: loop header
LB: loop body
LE: loop exit
PB: predicated region body
PF: predicated region fallthrough
CT: control target
= control target key end

     0   :  { %6 = vsyncpa [#allocation3], 0  ;;  %s722_s0 = inlined_call_operand.hbm [shape: f32[4,4,8,8], index: 0, kind: input, shape index: {}]   ;;  %s723_s1 = inlined_call_operand.hbm [shape: f32[4,2,4,8,8], index: 1, kind: output, shape index: {}]  }
   0x1   :  { %8 = vsyncpa [#allocation3 + $0x1], 0 }
   0x2   :  { %9 = vsyncpa [#allocation4], 0 }
   0x3   :  { %11 = vsyncpa [#allocation4 + $0x1], 0  ;;  %s556_s6 = smov 0   ;;  %s558_s7 = smov 0  }
   0x4   :  { %s560_s8 = smov 0   ;;  %s562_s9 = smov 0  }
   0x5   :  { %s564_s10 = smov 0   ;;  %s566_s11 = smov 0  }
   0x6   :  { %s568_s12 = smov 0   ;;  %s570_s13 = smov 0  }
   0x7   :  { %s572_s14 = smov 0   ;;  %s574_s15 = smov 0  }
   0x8   :  { %s576_s16 = smov 0  }
   0x9 LB: > { %s265_s17 = sadd.s32 4294967295, %s540_s16   ;;  %s266_s18 = sadd.s32 4294967294, %s540_s16   ;;  %s540_s16 = sphi %s576_s16, %s17_s16   ;;  %s536_s15 = sphi %s574_s15, %s743_s15   ;;  %s532_s14 = sphi %s572_s14, %s742_s14   ;;  %s528_s13 = sphi %s570_s13, %s741_s13   ;;  %s524_s12 = sphi %s568_s12, %s740_s12   ;;  %s520_s11 = sphi %s566_s11, %s739_s11   ;;  %s516_s10 = sphi %s564_s10, %s738_s10   ;;  %s512_s9 = sphi %s562_s9, %s737_s9   ;;  %s508_s8 = sphi %s560_s8, %s736_s8   ;;  %s504_s7 = sphi %s558_s7, %s735_s7   ;;  %s500_s6 = sphi %s556_s6, %s734_s6  }
   0xa   : > { %s26_s19 = sadd.s32 1, %s532_s14  ;;  %s29_s20 = sadd.s32 1, %s536_s15 }
   0xb   : > { %p27_p0 = scmp.ge.s32.totalorder %s26_s19, 2  ;;  %s36_s21 = sadd.s32 1, %s520_s11 }
   0xc   : > { %p43_p1 = scmp.ne.s32.totalorder %s520_s11, %s516_s10  ;;  %p44_p2 = scmp.eq.s32.totalorder %s540_s16, 0 }
   0xd   : > { %s745_s19 = smov (%p27_p0, %s26_s19), 0  ;;  %s747_s20 = smov (!%p27_p0, %s29_s20), %s536_s15 }
   0xe   : > { %726 = sst [smem:[#allocation8_spill]] %s745_s19  ;;  %p620_p3 = por %p44_p2, %p43_p1 }
   0xf   : > { %p49_p4 = scmp.ne.s32.totalorder %s516_s10, %s512_s9  ;;  %p31_p5 = scmp.ge.s32.totalorder %s747_s20, 4 }
  0x10   : > { %p50_p6 = scmp.eq.s32.totalorder %s265_s17, 0  ;;  %s60_s23 = ssub.s32 %s532_s14, %s745_s19 }
  0x11   : > { %s64_s24 = sadd.s32 1, %s508_s8  ;;  %s749_s20 = smov (%p31_p5, %s747_s20), 0 }
  0x12   : > { %728 = sst [smem:[#allocation9_spill]] %s749_s20  ;;  %p630_p7 = por %p50_p6, %p49_p4 }
  0x13   : > { %p74_p8 = scmp.ne.s32.totalorder %s508_s8, %s504_s7  ;;  %s33_s26 = ssub.s32 %s536_s15, %s749_s20 }
  0x14   : > { %p75_p9 = scmp.eq.s32.totalorder %s265_s17, 7  ;;  %p34_p10 = scmp.eq.s32.totalorder %s33_s26, 0 }
  0x15   : > { %s61_s27 = sor.u32 %s60_s23, %s33_s26  ;;  %p80_p13 = scmp.ne.s32.totalorder %s504_s7, %s500_s6 }
  0x16   : > { %p62_p11 = scmp.eq.s32.totalorder %s61_s27, 0  ;;  %p638_p12 = por %p75_p9, %p74_p8 }
  0x17   : > { %s643_s29 = scalar_select %p34_p10, %s520_s11, %s36_s21  }
  0x18   : > { %s646_s30 = scalar_select %p62_p11, %s508_s8, %s64_s24  }
  0x19   : > { %p81_p0 = scmp.eq.s32.totalorder %s266_s18, 7  ;;  %p294_p1 = scmp.lt.s32.totalorder %s540_s16, 8 }
  0x1a   : > { %s101_s3 = sand.u32 1, %s520_s11   ;;  %s281_s5 = sshll.u32 %s536_s15, 5 }
  0x1b   : > { %p651_p2 = por %p81_p0, %p80_p13  ;;  %s269_s4 = sshll.u32 %s101_s3, 5 }
  0x1c   : > { %s110_s23 = scalar_lea.hbm %s722_s0, %s281_s5  ;;  %s105_s21 = scalar_lea.vmem [#allocation2], %s269_s4 }
  0x1d   : > { %s113_s26 = sshll.u32 %s105_s21, 4  ;;  %s111_s27 = sshll.u32 %s110_s23, 4  ;;  %s114_s26 = int_to_ptr.vmem [resolvable:$true] %s113_s26  ;;  %s112_s27 = int_to_ptr.hbm [resolvable:$true] %s111_s27 }
  0x1e   : > { %p287_p4 = pnand %p294_p1, %p620_p3  ;;  %p272_p5 = scmp.ge.s32.totalorder %s540_s16, 1 }
  0x1f   : > { %s102_s18 = scalar_lea.sflag [#allocation3], %s101_s3  ;;  %s542_s24 = smov 128  }
  0x20   : > { %s543_s20 = smov 8   ;;  %p121_p6 = scmp.lt.s32.totalorder %s540_s16, 9 }
  0x21   : > { %289 = dma.hbm_to_vmem [thread:$0]  (!%p287_p4), %s112_s27, 512, %s114_s26, %s102_s18, %s542_s24, %s542_s24, %s543_s20  }
  0x22   : > { %p122_p8 = pnand %p272_p5, %p121_p6 }
  0x23   : > { %s127_s19 = sand.u32 (!%p122_p8), 1, %s516_s10  }
  0x24   : > { %125 = sbr.rel (%p122_p8) target bundleno = 61 (0x3d), region = 24  ;;  %s273_s9 = sshll.u32 (!%p122_p8), %s127_s19, 5 }
  0x25   : > { %s128_s5 = scalar_lea.sflag (!%p122_p8), [#allocation3], %s127_s19  ;;  %s131_s4 = scalar_lea.vmem (!%p122_p8), [#allocation2], %s273_s9 }
  0x29   : > { %491 = dma.done.wait (%p630_p7), %s128_s5, 512  }
  0x2a   : > { %493 = vsyncadd (%p630_p7), %s128_s5, 4294966784  ;;  %s148_s22 = sand.u32 1, %s504_s7   ;;  %s276_s3 = sshll.u32 %s524_s12, 2  ;;  %vm155_vm0 = vcmask 64512   ;;  %v151_v0 = vld [vmem:[%s131_s4] sm:$0xff]  ;;  %v152_v1 = vld [vmem:[%s131_s4 + $0x8] sm:$0xff] }
  0x2b   : > { %s274_s20 = sshll.u32 %s148_s22, 5  ;;  %s277_s17 = sshll.u32 %s528_s13, 3  ;;  %v153_v2 = vld [vmem:[%s131_s4 + $0x10] sm:$0xff]  ;;  %v154_v3 = vld [vmem:[%s131_s4 + $0x18] sm:$0xff] }
  0x2c   : > { %s172_s23 = sadd.s32 %s277_s17, %s276_s3  ;;  %s150_s26 = scalar_lea.vmem [#allocation5], %s274_s20 }
  0x2d   : > { %s278_s21 = sshll.u32 %s172_s23, 3  ;;  %s175_s27 = sshll.u32 %s150_s26, 4  ;;  %156 = vst.msk [vmem:[%s150_s26] sm:$0xff] %vm155_vm0, %v151_v0  ;;  %s176_s27 = int_to_ptr.vmem [resolvable:$true] %s175_s27 }
  0x2e   : > { %s174_s24 = scalar_lea.hbm %s723_s1, %s278_s21  ;;  %157 = vst.msk [vmem:[%s150_s26 + $0x8] sm:$0xff] %vm155_vm0, %v152_v1  ;;  %s161_s12 = scalar_lea.sflag [#allocation4], %s148_s22 }
  0x2f   : > { %s177_s9 = sshll.u32 %s174_s24, 4  ;;  %158 = vst.msk [vmem:[%s150_s26 + $0x10] sm:$0xff] %vm155_vm0, %v153_v2  ;;  %s438_s20 = scalar_lea.hbm %s723_s1, 256  ;;  %s178_s9 = int_to_ptr.hbm [resolvable:$true] %s177_s9 }
  0x30   : > { %159 = vst.msk [vmem:[%s150_s26 + $0x18] sm:$0xff] %vm155_vm0, %v154_v3  ;;  %s432_s13 = sshra.s32 %s178_s9, 4  ;;  %s433_s13 = int_to_ptr.hbm [resolvable:$true] %s432_s13 }
  0x31   : > { %s434_s25 = scalar_lea.hbm %s433_s13, 32  ;;  %p439_p10 = scmp.lt.s32.totalorder %s433_s13, %s723_s1 }
  0x32   : > { %p435_p3 = scmp.ne.s32.totalorder %s433_s13, %s434_s25  ;;  %p440_p11 = scmp.lt.s32.totalorder %s438_s20, %s434_s25 }
  0x34   : > { %p436_p7 = pnand %p435_p3, %p638_p12  ;;  %p441_p13 = por %p440_p11, %p439_p10 }
  0x36   : > { %p437_p9 = pneg %p436_p7 }
  0x38   : > { %p442_p0 = pnand %p441_p13, %p437_p9 }
  0x3a   : > { %445 = shalt.err (!%p442_p0)
}
  0x3b   : > { %s544_s4 = smov 128   ;;  %s545_s22 = smov 8  }
  0x3c   : > { %284 = dma.vmem_to_hbm [thread:$0]  (%p638_p12), %s176_s27, 512, %s178_s9, %s161_s12, %s544_s4, %s544_s4, %s545_s22  }
  0x3d PF: > { %p295_p1 = scmp.ge.s32.totalorder %s540_s16, 2  ;;  %s192_s21 = sand.u32 1, %s500_s6  }
  0x3e   : > { %s193_s26 = scalar_lea.sflag [#allocation4], %s192_s21 }
  0x3f   : > { %p291_p4 = pnand %p295_p1, %p651_p2 }
  0x41   : > { %p292_p5 = pneg %p291_p4 }
  0x43   : > { %495 = dma.done.wait (%p292_p5), %s193_s26, 512  }
  0x44   : > { %497 = vsyncadd (%p292_p5), %s193_s26, 4294966784  ;;  %s17_s16 = sadd.s32 1, %s540_s16   ;;  %s732_s28 = sld [smem:[#allocation8_spill]] }
  0x45   : > { %p14_p6 = scmp.ge.s32.totalorder %s17_s16, 10   ;;  %s733_s27 = sld [smem:[#allocation9_spill]] }
  0x46   : > { %s734_s6 = smov %s504_s7  ;;  %s735_s7 = smov %s508_s8 }
  0x47   : > { %s736_s8 = smov %s646_s30  ;;  %s737_s9 = smov %s516_s10 }
  0x48   : > { %s738_s10 = smov %s520_s11  ;;  %s739_s11 = smov %s643_s29 }
  0x49   : > { %s740_s12 = smov %s532_s14  ;;  %s741_s13 = smov %s536_s15 }
  0x4a   : > { %s742_s14 = smov %s732_s28  ;;  %16 = sbr.rel (!%p14_p6) target bundleno = 9 (0x9), region = 69 }
  0x4b   : > { %s743_s15 = smov %s733_s27 }
  0x4f   :  { %199 = vsyncpa [#allocation3], 1 }
  0x50   :  { %201 = vsyncpa [#allocation3 + $0x1], 1 }
  0x51   :  { %202 = vsyncpa [#allocation4], 1 }
  0x52   :  { %204 = vsyncpa [#allocation4 + $0x1], 1 }

</bundles_post_ra>
